<compile_context>
chip_gen: v7x
topology: tpu7x:2x2x1
jax: 0.10.0
libtpu: 0.0.40
codegen_flags: <defaults>
</compile_context>

<pallas_src>
import functools

import jax
import jax.numpy as jnp
from jax.experimental import pallas as pl
from jax.experimental.pallas import tpu as pltpu


def _round_up(x, m):
    return (x + m - 1) // m * m


def _emb_linear_kernel(x_ref, wt_ref, b_ref, o_ref):
    # x_ref : (tile_m, D_in)    VMEM (input dtype)
    # wt_ref: (D_in,  tile_n)   VMEM (compute dtype, e.g. bf16) == W^T block
    # b_ref : (1,     tile_n)   VMEM f32
    # o_ref : (tile_m, tile_n)  VMEM (input dtype)
    x = x_ref[...].astype(wt_ref.dtype)              # bf16 datapath, f32 accumulate
    acc = jnp.dot(x, wt_ref[...], preferred_element_type=jnp.float32)
    o_ref[...] = (acc + b_ref[...]).astype(o_ref.dtype)


def prepare_emb_linear_params(weight, bias, compute_dtype=jnp.bfloat16):
    """One-time parameter prep (call at parameter-load time, NOT per forward).

    weight: (D_out, D_in) torch nn.Linear layout; bias: (D_out,).
    Returns (wt, b2, d_out):
      wt : W^T, cast to `compute_dtype`, lane-padded to (D_in, round_up(D_out,128))
      b2 : bias in f32, padded to (1, round_up(D_out,128))
    """
    d_out, d_in = weight.shape
    d_out_pad = _round_up(d_out, 128)
    wt = jnp.asarray(weight).T.astype(compute_dtype)           # (D_in, D_out)
    wt = jnp.pad(wt, ((0, 0), (0, d_out_pad - d_out)))
    b2 = jnp.pad(jnp.asarray(bias).astype(jnp.float32), (0, d_out_pad - d_out))
    b2 = b2.reshape(1, d_out_pad)
    return wt, b2, int(d_out)


@functools.partial(jax.jit, static_argnames=("d_out", "tile_m", "tile_n"))
def _emb_linear_call(x, wt, b2, *, d_out, tile_m, tile_n):
    T, d_in = x.shape
    d_out_pad = wt.shape[1]

    # Pad rows to a multiple of tile_m so the grid is exact.
    t_pad = pl.cdiv(T, tile_m) * tile_m
    if t_pad != T:
        x = jnp.pad(x, ((0, t_pad - T), (0, 0)))

    gm = t_pad // tile_m
    gn = d_out_pad // tile_n

    # Weight/bias never change block index when gn == 1 -> single-buffer them.
    const_wb = gn == 1
    wb_kwargs = {"pipeline_mode": pl.Buffered(1)} if const_wb else {}
    w_bufs = 1 if const_wb else 2

    # Size the scoped VMEM budget off the actual tile footprint (+25% headroom),
    # capped so it stays valid on v7x's 64 MiB VMEM.
    x_bytes = jnp.dtype(x.dtype).itemsize
    w_bytes = jnp.dtype(wt.dtype).itemsize
    vmem_need = (2 * tile_m * d_in * x_bytes            # x tile, double-buffered
                 + w_bufs * d_in * tile_n * w_bytes     # weight block(s)
                 + w_bufs * tile_n * 4                  # bias block(s)
                 + 2 * tile_m * tile_n * x_bytes)       # output tile, double-buffered
    vmem_limit = int(min(64 << 20, max(vmem_need * 5 // 4 + (2 << 20), 32 << 20)))

    out = pl.pallas_call(
        _emb_linear_kernel,
        out_shape=jax.ShapeDtypeStruct((t_pad, d_out_pad), x.dtype),
        grid_spec=pltpu.PrefetchScalarGridSpec(
            num_scalar_prefetch=0,
            grid=(gm, gn),
            in_specs=[
                pl.BlockSpec((tile_m, d_in), lambda i, j: (i, 0)),
                pl.BlockSpec((d_in, tile_n), lambda i, j: (0, j), **wb_kwargs),
                pl.BlockSpec((1, tile_n), lambda i, j: (0, j), **wb_kwargs),
            ],
            out_specs=pl.BlockSpec((tile_m, tile_n), lambda i, j: (i, j)),
        ),
        compiler_params=pltpu.CompilerParams(
            dimension_semantics=("parallel", "parallel"),
            vmem_limit_bytes=vmem_limit,
        ),
    )(x, wt, b2)

    # Slice off row padding and lane padding (no-op when nothing was padded).
    return out[:T, :d_out]


def emb_linear_pallas(x, wt, b2, d_out, *, tile_m=None, tile_n=None):
    """y = x @ W^T + b with prepared params (see prepare_emb_linear_params)."""
    T, _ = x.shape
    d_out_pad = wt.shape[1]
    sub = 8 if jnp.dtype(x.dtype).itemsize >= 4 else 16   # sublane multiple

    if tile_m is None:
        # Big pipelined row tiles for real inputs; single aligned block for tiny T.
        tile_m = 512 if T > 512 else _round_up(T, sub)
    else:
        tile_m = min(_round_up(int(tile_m), sub), _round_up(T, sub))

    if tile_n is None:
        tile_n = min(512, d_out_pad)
    else:
        tile_n = min(_round_up(int(tile_n), 128), d_out_pad)
    while d_out_pad % tile_n != 0:     # tile_n must divide the lane-padded D_out
        tile_n -= 128

    return _emb_linear_call(x, wt, b2, d_out=d_out, tile_m=tile_m, tile_n=tile_n)


def emb_linear_forward(input_, params, *, tile_m=None, tile_n=None):
    """Mirrors EmbLinear.forward: apply the linear to the packed embedding data
    tensor; boundaries (packed-sequence metadata) pass through unchanged."""
    # TODO(synk): the original operates on a PackedSequencePlus via .apply();
    # here we compute directly on its packed `data` tensor.
    all_embs, boundaries = input_
    wt, b2, d_out = params
    new_embs = emb_linear_pallas(all_embs, wt, b2, d_out, tile_m=tile_m, tile_n=tile_n)
    return (new_embs, boundaries)


if __name__ == "__main__":
    key = jax.random.PRNGKey(0)
    k_x, k_w, k_b = jax.random.split(key, 3)

    # Small shapes consistent with the module: T tokens, hidden 32 -> 48.
    T, d_in, d_out = 16, 32, 48

    all_embs = jax.random.normal(k_x, (T, d_in), dtype=jnp.float32)
    boundaries = [[0, 5, 9, T]]   # opaque pass-through metadata

    # Deterministic nn.Linear-style init: U(-1/sqrt(in), 1/sqrt(in)).
    bound = 1.0 / (d_in ** 0.5)
    weight = jax.random.uniform(k_w, (d_out, d_in), jnp.float32, -bound, bound)
    bias = jax.random.uniform(k_b, (d_out,), jnp.float32, -bound, bound)

    # One-time parameter prep (transpose + bf16 cast + lane padding hoisted
    # out of the per-call path).
    params = prepare_emb_linear_params(weight, bias)

    out_embs, out_boundaries = emb_linear_forward((all_embs, boundaries), params)
    out_embs = jax.block_until_ready(out_embs)

    # References: bf16-matched datapath (tight) and full-f32 module semantics (loose).
    ref_bf16 = (jnp.dot(all_embs.astype(jnp.bfloat16),
                        weight.T.astype(jnp.bfloat16),
                        preferred_element_type=jnp.float32) + bias)
    ref_f32 = all_embs @ weight.T + bias

    assert out_embs.shape == (T, d_out)
    assert out_embs.dtype == all_embs.dtype
    assert jnp.allclose(out_embs, ref_bf16, atol=2e-3, rtol=2e-3)
    assert jnp.allclose(out_embs, ref_f32, atol=5e-2, rtol=5e-2)
    assert out_boundaries is boundaries

    print("KERNEL_OK")
</pallas_src>

<mosaic_0001>
module attributes {stable_mosaic.version = 11 : i64} {
  func.func @_emb_linear_kernel(%arg0: i32, %arg1: i32, %arg2: memref<16x32xf32, #tpu.memory_space<vmem>>, %arg3: memref<32x128xbf16, #tpu.memory_space<vmem>>, %arg4: memref<1x128xf32, #tpu.memory_space<vmem>>, %arg5: memref<16x128xf32, #tpu.memory_space<vmem>>) attributes {dimension_semantics = [#tpu.dimension_semantics<parallel>, #tpu.dimension_semantics<parallel>], iteration_bounds = array<i64: 1, 1>, scalar_prefetch = 0 : i64, scratch_operands = 0 : i64, tpu.core_type = #tpu.core_type<tc>, window_params = [{transform_indices = @transform_0, window_bounds = array<i64: 16, 32>}, {pipeline_mode = #tpu.pipeline_mode<synchronous>, transform_indices = @transform_1, window_bounds = array<i64: 32, 128>}, {pipeline_mode = #tpu.pipeline_mode<synchronous>, transform_indices = @transform_2, window_bounds = array<i64: 1, 128>}, {transform_indices = @transform_3, window_bounds = array<i64: 16, 128>}]} {
    %c0 = arith.constant 0 : index
    %c0_0 = arith.constant 0 : index
    %0 = vector.load %arg2[%c0, %c0_0] : memref<16x32xf32, #tpu.memory_space<vmem>>, vector<16x32xf32>
    %1 = arith.truncf %0 : vector<16x32xf32> to vector<16x32xbf16>
    %c0_1 = arith.constant 0 : index
    %c0_2 = arith.constant 0 : index
    %2 = vector.load %arg3[%c0_1, %c0_2] : memref<32x128xbf16, #tpu.memory_space<vmem>>, vector<32x128xbf16>
    %cst = arith.constant dense<0.000000e+00> : vector<16x128xf32>
    %3 = tpu.matmul %1, %2, %cst {dimension_numbers = #tpu.dot_dimension_numbers<[1], [0], [0], [1], [0, 0, 1, 1], [], []>} : vector<16x32xbf16>, vector<32x128xbf16>, vector<16x128xf32> -> vector<16x128xf32>
    %c0_3 = arith.constant 0 : index
    %c0_4 = arith.constant 0 : index
    %4 = vector.load %arg4[%c0_3, %c0_4] : memref<1x128xf32, #tpu.memory_space<vmem>>, vector<1x128xf32>
    %5 = vector.broadcast %4 : vector<1x128xf32> to vector<16x128xf32>
    %6 = arith.addf %3, %5 : vector<16x128xf32>
    %c0_5 = arith.constant 0 : index
    %c0_6 = arith.constant 0 : index
    %7 = vector.load %arg5[%c0_5, %c0_6] : memref<16x128xf32, #tpu.memory_space<vmem>>, vector<16x128xf32>
    tpu.vector_store %arg5[%c0_5, %c0_6], %6 {strides = array<i32>} : memref<16x128xf32, #tpu.memory_space<vmem>>, vector<16x128xf32>,
    return
  }
  func.func @transform_0(%arg0: i32, %arg1: i32) -> (i32, i32) {
    %c0_i32 = arith.constant 0 : i32
    %c0_i32_0 = arith.constant 0 : i32
    return %arg0, %c0_i32 : i32, i32
  }
  func.func @transform_1(%arg0: i32, %arg1: i32) -> (i32, i32) {
    %c0_i32 = arith.constant 0 : i32
    %c0_i32_0 = arith.constant 0 : i32
    return %c0_i32, %arg1 : i32, i32
  }
  func.func @transform_2(%arg0: i32, %arg1: i32) -> (i32, i32) {
    %c0_i32 = arith.constant 0 : i32
    %c0_i32_0 = arith.constant 0 : i32
    return %c0_i32, %arg1 : i32, i32
  }
  func.func @transform_3(%arg0: i32, %arg1: i32) -> (i32, i32) {
    %c0_i32 = arith.constant 0 : i32
    return %arg0, %arg1 : i32, i32
  }
}

</mosaic_0001>

<bundles_post_ra>
// kernel: _emb_linear_call.1
= control target key start
LH: loop header
LB: loop body
LE: loop exit
PB: predicated region body
PF: predicated region fallthrough
CT: control target
= control target key end

     0   :  { %8 = vsyncpa [#allocation3], 0  ;;  %s307_s0 = inlined_call_operand.hbm [shape: f32[16,32], index: 0, kind: input, shape index: {}]   ;;  %s308_s1 = inlined_call_operand.hbm [shape: bf16[32,128], index: 1, kind: input, shape index: {}]   ;;  %s309_s2 = inlined_call_operand.vmem [shape: f32[1,128], index: 2, kind: input, shape index: {}]   ;;  %s310_s3 = inlined_call_operand.hbm [shape: f32[16,128], index: 3, kind: output, shape index: {}]  }
   0x1   :  { %9 = vsyncpa [#allocation6], 0 }
   0x2   :  { %10 = vsyncpa [#allocation4], 0  ;;  %s233_s12 = smov [#allocation2]   ;;  %s161_s16 = scalar_lea.hbm %s307_s0, 256 }
   0x3   :  { %s16_s13 = sshll.u32 %s233_s12, 4  ;;  %p162_p0 = scmp.ne.s32.totalorder %s307_s0, %s161_s16  ;;  %s17_s13 = int_to_ptr.vmem [resolvable:$true] %s16_s13 }
   0x4   :  { %p165_p1 = scmp.lt.u32.totalorder %s161_s16, %s307_s0 }
   0x6   :  { %p167_p2 = pnand %p165_p1, %p162_p0 }
   0x8   :  { %170 = shalt.err (!%p167_p2)
}
   0x9   :  { %s171_s21 = scalar_lea.vmem %s17_s13, 256  ;;  %p176_p4 = scmp.lt.s32.totalorder %s17_s13, %s17_s13 }
   0xa   :  { %p172_p3 = scmp.ne.s32.totalorder %s17_s13, %s171_s21  ;;  %p177_p5 = scmp.lt.s32.totalorder %s171_s21, %s171_s21 }
   0xc   :  { %p178_p6 = por %p177_p5, %p176_p4 }
   0xe   :  { %p179_p7 = pnand %p178_p6, %p172_p3 }
  0x10   :  { %182 = shalt.err (!%p179_p7)
}
  0x11   :  { %s234_s22 = smov 128   ;;  %s235_s23 = smov 8  }
  0x12   :  { %22 = dma.hbm_to_vmem [thread:$0]  %s307_s0, 256, %s17_s13, [#allocation3], %s234_s22, %s234_s22, %s235_s23  }
  0x13   :  { %s236_s26 = smov [#allocation5]   ;;  %s183_s30 = scalar_lea.hbm %s308_s1, 256 }
  0x14   :  { %s28_s27 = sshll.u32 %s236_s26, 4  ;;  %p184_p8 = scmp.ne.s32.totalorder %s308_s1, %s183_s30  ;;  %s29_s27 = int_to_ptr.vmem [resolvable:$true] %s28_s27 }
  0x15   :  { %p187_p9 = scmp.lt.u32.totalorder %s183_s30, %s308_s1 }
  0x17   :  { %p189_p10 = pnand %p187_p9, %p184_p8 }
  0x19   :  { %192 = shalt.err (!%p189_p10)
}
  0x1a   :  { %s193_s8 = scalar_lea.vmem %s29_s27, 256  ;;  %p198_p12 = scmp.lt.s32.totalorder %s29_s27, %s29_s27 }
  0x1b   :  { %p194_p11 = scmp.ne.s32.totalorder %s29_s27, %s193_s8  ;;  %p199_p13 = scmp.lt.s32.totalorder %s193_s8, %s193_s8 }
  0x1d   :  { %p200_p0 = por %p199_p13, %p198_p12 }
  0x1f   :  { %p201_p1 = pnand %p200_p0, %p194_p11 }
  0x21   :  { %204 = shalt.err (!%p201_p1)
}
  0x22   :  { %s237_s0 = smov 64   ;;  %s238_s9 = smov 4  }
  0x23   :  { %34 = dma.hbm_to_vmem [thread:$0]  %s308_s1, 256, %s29_s27, [#allocation6], %s237_s0, %s237_s0, %s238_s9  }
  0x24   :  { %227 = dma.done.wait [#allocation3], 256  }
  0x25   :  { %228 = vsyncadd [#allocation3], 4294967040 }
  0x26   :  { %229 = dma.done.wait [#allocation6], 256  }
  0x27   :  { %230 = vsyncadd [#allocation6], 4294967040  ;;  %v239_v0 = vmov 0.0   ;;  %vm240_vm0 = vmmov 0   ;;  %v159_v1 = vld [vmem:[#allocation5] sm:$0xff]   ;;  %v160_v2 = vld [vmem:[#allocation5 + $0x8] sm:$0xff]  }
  0x28   :  { %142 = vmatprep.subr.bf16.mxu0 %v239_v0  ;;  %146 = vmatprep.mubr.msk.bf16.mxu0 %vm240_vm0, %v239_v0  ;;  %v44_v3 = vld [vmem:[#allocation2] sm:$0xff]  ;;  %v45_v4 = vld [vmem:[#allocation2 + $0x8] sm:$0xff]  ;;  %vm70_vm1 = vcmask 261120   ;;  %s241_s13 = smov [#allocation7]  }
  0x29   :  { %143 = vmatpush3.bf16.msra.mxu0 %v159_v1  ;;  %v46_v5 = vpack.c.bf16 %v45_v4, %v44_v3  ;;  %v135_v6 = vld [vmem:[%s309_s2] ss:$0 sm:$0xff]  ;;  %s122_s14 = sshll.u32 %s241_s13, 4  ;;  %s123_s14 = int_to_ptr.vmem [resolvable:$true] %s122_s14 }
  0x2a   :  { %144 = vmatprep.subr.bf16.mxu0 %v239_v0  ;;  %s205_s15 = scalar_lea.vmem %s123_s14, 256  ;;  %p210_p3 = scmp.lt.s32.totalorder %s123_s14, %s123_s14 }
  0x2b   :  { %p206_p2 = scmp.ne.s32.totalorder %s123_s14, %s205_s15  ;;  %p211_p4 = scmp.lt.s32.totalorder %s205_s15, %s205_s15 }
  0x2d   :  { %145 = vmatpush3.bf16.msra.mxu0 %v160_v2  ;;  %p212_p5 = por %p211_p4, %p210_p3 }
  0x2f   :  { %p213_p6 = pnand %p212_p5, %p206_p2 }
  0x30   :  { %147 = vmatmul.mubr.msk.bf16.vlgmr.msra.gmra.mrb[0].mxu0 %vm70_vm1, %v46_v5 }
 0x103   :  { %v108_v7 = vpop.f32.mrb[0].mxu0 }
 0x104   :  { %v109_v8 = vadd.f32 %v135_v6, %v108_v7  ;;  %v148_v9 = vpop.f32.mrb[1].mxu0 }
 0x105   :  { %v111_v10 = vpop.f32.mrb[2].mxu0 }
 0x106   :  { %115 = vst [vmem:[#allocation7] sm:$0xff] %v109_v8  ;;  %v112_v11 = vadd.f32 %v135_v6, %v111_v10  ;;  %v149_v12 = vpop.f32.mrb[3].mxu0 }
 0x108   :  { %116 = vst [vmem:[#allocation7 + $0x8] sm:$0xff] %v112_v11 }
 0x109   :  { %216 = shalt.err (!%p213_p6)
}
 0x10a   :  { %s217_s17 = scalar_lea.hbm %s310_s3, 256 }
 0x10b   :  { %p218_p7 = scmp.ne.s32.totalorder %s310_s3, %s217_s17  ;;  %p221_p8 = scmp.lt.u32.totalorder %s217_s17, %s310_s3 }
 0x10d   :  { %p223_p9 = pnand %p221_p8, %p218_p7 }
 0x10f   :  { %226 = shalt.err (!%p223_p9)
}
 0x110   :  { %128 = dma.vmem_to_hbm [thread:$0]  %s123_s14, 256, %s310_s3, [#allocation4], %s234_s22, %s234_s22, %s235_s23  }
 0x111   :  { %231 = dma.done.wait [#allocation4], 256  }
 0x112   :  { %232 = vsyncadd [#allocation4], 4294967040 }
 0x113   :  { %132 = vsyncpa [#allocation3], 1 }
 0x114   :  { %133 = vsyncpa [#allocation6], 1 }
 0x115   :  { %134 = vsyncpa [#allocation4], 1 }

</bundles_post_ra>
